<compile_context>
chip_gen: v7x
topology: tpu7x:2x2x1
jax: 0.10.0
libtpu: 0.0.40
codegen_flags: <defaults>
</compile_context>

<pallas_src>
import functools

import jax
import jax.numpy as jnp
from jax.experimental import pallas as pl
from jax.experimental.pallas import tpu as pltpu


CFG = dict(vocab=100, hidden=32, heads=2, layers=2, inter=64,
           max_pos=16, type_vocab=2, num_labels=3)


# ----------------------------------------------------------------------------
# Small helpers
# ----------------------------------------------------------------------------

def _replicated(shape):
    """Whole-array block, same block index every grid step (stays resident)."""
    return pl.BlockSpec(shape, lambda b: (0,) * len(shape))


def _ln(x, g, b, eps):
    mu = jnp.mean(x, axis=-1, keepdims=True)
    xc = x - mu
    var = jnp.mean(xc * xc, axis=-1, keepdims=True)
    return xc * jax.lax.rsqrt(var + eps) * g + b


def _gelu_tanh(y):
    # TODO(synk): HF BERT default hidden_act is exact erf-GELU; the tanh
    # approximation is used here for robust Mosaic/EUP lowering.
    return 0.5 * y * (1.0 + jnp.tanh(0.7978845608028654 * (y + 0.044715 * y * y * y)))


# ----------------------------------------------------------------------------
# Kernel 1: embedding LayerNorm (no residual), grid over batch
# ----------------------------------------------------------------------------

def _emb_ln_kernel(x_ref, g_ref, b_ref, o_ref, *, eps):
    o_ref[0] = _ln(x_ref[0], g_ref[...], b_ref[...], eps)


def embedding_layernorm(x, gamma, beta, eps=1e-12):
    B, S, H = x.shape
    act_spec = pl.BlockSpec((1, S, H), lambda b: (b, 0, 0))
    return pl.pallas_call(
        functools.partial(_emb_ln_kernel, eps=eps),
        out_shape=jax.ShapeDtypeStruct((B, S, H), jnp.float32),
        grid=(B,),
        in_specs=[act_spec, _replicated((1, H)), _replicated((1, H))],
        out_specs=act_spec,
        compiler_params=pltpu.CompilerParams(dimension_semantics=("parallel",)),
    )(x, gamma, beta)


# ----------------------------------------------------------------------------
# Kernel 2: fused encoder layer (QKV + attention + out-proj + LN + FFN + LN)
# ----------------------------------------------------------------------------

def _layer_kernel(x_ref, mask_ref,
                  wqkv_ref, bqkv_ref, wo_ref, bo_ref, ln1g_ref, ln1b_ref,
                  wi_ref, bi_ref, wo2_ref, bo2_ref, ln2g_ref, ln2b_ref,
                  o_ref, *, nh, dh, scale, eps):
    H = nh * dh
    x = x_ref[0]                                   # [S, H] f32 (one batch row)
    mask = mask_ref[0]                             # [1, S] additive mask

    # Fused QKV projection: bf16 MXU inputs, f32 accumulation.
    qkv = jnp.dot(x.astype(jnp.bfloat16), wqkv_ref[...],
                  preferred_element_type=jnp.float32) + bqkv_ref[...]   # [S, 3H]

    ctx_parts = []
    for h in range(nh):                            # static unroll over heads
        q = qkv[:, h * dh:(h + 1) * dh].astype(jnp.bfloat16)
        k = qkv[:, H + h * dh:H + (h + 1) * dh].astype(jnp.bfloat16)
        v = qkv[:, 2 * H + h * dh:2 * H + (h + 1) * dh].astype(jnp.bfloat16)
        s = jnp.einsum("qd,kd->qk", q, k,
                       preferred_element_type=jnp.float32) * scale + mask
        s = s - jnp.max(s, axis=-1, keepdims=True)
        p = jnp.exp(s)
        p = p * pl.reciprocal(jnp.sum(p, axis=-1, keepdims=True), approx=True)
        ctx_parts.append(jnp.dot(p.astype(jnp.bfloat16), v,
                                 preferred_element_type=jnp.float32))
    ctx = jnp.concatenate(ctx_parts, axis=-1)      # [S, H] f32

    # Attention output projection + residual + LayerNorm (fused epilogue).
    attn = jnp.dot(ctx.astype(jnp.bfloat16), wo_ref[...],
                   preferred_element_type=jnp.float32) + bo_ref[...]
    h1 = _ln(attn + x, ln1g_ref[...], ln1b_ref[...], eps)

    # Feed-forward + residual + LayerNorm (fused epilogue).
    inter = jnp.dot(h1.astype(jnp.bfloat16), wi_ref[...],
                    preferred_element_type=jnp.float32) + bi_ref[...]
    inter = _gelu_tanh(inter)
    ff = jnp.dot(inter.astype(jnp.bfloat16), wo2_ref[...],
                 preferred_element_type=jnp.float32) + bo2_ref[...]
    o_ref[0] = _ln(ff + h1, ln2g_ref[...], ln2b_ref[...], eps)


def encoder_layer(x, amask, lw, *, nh, eps=1e-12):
    B, S, H = x.shape
    dh = H // nh
    act_spec = pl.BlockSpec((1, S, H), lambda b: (b, 0, 0))
    mask_spec = pl.BlockSpec((1, 1, S), lambda b: (b, 0, 0))
    return pl.pallas_call(
        functools.partial(_layer_kernel, nh=nh, dh=dh,
                          scale=1.0 / float(dh) ** 0.5, eps=eps),
        out_shape=jax.ShapeDtypeStruct((B, S, H), jnp.float32),
        grid=(B,),
        in_specs=[act_spec, mask_spec,
                  _replicated(lw["wqkv"].shape), _replicated(lw["bqkv"].shape),
                  _replicated(lw["wo"].shape), _replicated(lw["bo"].shape),
                  _replicated(lw["ln1_g"].shape), _replicated(lw["ln1_b"].shape),
                  _replicated(lw["wi"].shape), _replicated(lw["bi"].shape),
                  _replicated(lw["wo2"].shape), _replicated(lw["bo2"].shape),
                  _replicated(lw["ln2_g"].shape), _replicated(lw["ln2_b"].shape)],
        out_specs=act_spec,
        compiler_params=pltpu.CompilerParams(
            dimension_semantics=("parallel",),
            vmem_limit_bytes=32 * 1024 * 1024),
    )(x, amask, lw["wqkv"], lw["bqkv"], lw["wo"], lw["bo"],
      lw["ln1_g"], lw["ln1_b"], lw["wi"], lw["bi"],
      lw["wo2"], lw["bo2"], lw["ln2_g"], lw["ln2_b"])


# ----------------------------------------------------------------------------
# Kernel 3: fused pooler (tanh) + classifier head
# ----------------------------------------------------------------------------

def _head_kernel(x_ref, pw_ref, pb_ref, cw_ref, cb_ref, o_ref):
    pooled = jnp.tanh(jnp.dot(x_ref[...], pw_ref[...],
                              preferred_element_type=jnp.float32) + pb_ref[...])
    o_ref[...] = jnp.dot(pooled, cw_ref[...],
                         preferred_element_type=jnp.float32) + cb_ref[...]


def pooler_classifier(cls_tok, pw, pb, cw, cb):
    B, H = cls_tok.shape
    L = cw.shape[1]
    full = lambda shape: pl.BlockSpec(shape, lambda: (0,) * len(shape))
    return pl.pallas_call(
        _head_kernel,
        out_shape=jax.ShapeDtypeStruct((B, L), jnp.float32),
        in_specs=[full((B, H)), full((H, H)), full((1, H)),
                  full((H, L)), full((1, L))],
        out_specs=full((B, L)),
    )(cls_tok, pw, pb, cw, cb)


# ----------------------------------------------------------------------------
# Synthetic tiny-BERT parameters and forward pass
# ----------------------------------------------------------------------------

def init_params(key, cfg):
    std = 0.02
    keys = iter(jax.random.split(key, 256))

    def nrm(shape):
        return std * jax.random.normal(next(keys), shape, dtype=jnp.float32)

    H, I = cfg["hidden"], cfg["inter"]
    p = {
        "word_emb": nrm((cfg["vocab"], H)),
        "pos_emb": nrm((cfg["max_pos"], H)),
        "type_emb": nrm((cfg["type_vocab"], H)),
        "emb_ln_g": jnp.ones((1, H), jnp.float32),
        "emb_ln_b": jnp.zeros((1, H), jnp.float32),
        "pool_w": nrm((H, H)), "pool_b": jnp.zeros((1, H), jnp.float32),
        "cls_w": nrm((H, cfg["num_labels"])),
        "cls_b": jnp.zeros((1, cfg["num_labels"]), jnp.float32),
        "layers": [],
    }
    for _ in range(cfg["layers"]):
        wq, wk, wv = nrm((H, H)), nrm((H, H)), nrm((H, H))
        p["layers"].append({
            # Fused QKV weight; matmul weights stored bf16 (MXU inputs, half DMA).
            "wqkv": jnp.concatenate([wq, wk, wv], axis=1).astype(jnp.bfloat16),
            "bqkv": jnp.zeros((1, 3 * H), jnp.float32),
            "wo": nrm((H, H)).astype(jnp.bfloat16),
            "bo": jnp.zeros((1, H), jnp.float32),
            "ln1_g": jnp.ones((1, H), jnp.float32),
            "ln1_b": jnp.zeros((1, H), jnp.float32),
            "wi": nrm((H, I)).astype(jnp.bfloat16),
            "bi": jnp.zeros((1, I), jnp.float32),
            "wo2": nrm((I, H)).astype(jnp.bfloat16),
            "bo2": jnp.zeros((1, H), jnp.float32),
            "ln2_g": jnp.ones((1, H), jnp.float32),
            "ln2_b": jnp.zeros((1, H), jnp.float32),
        })
    return p


def bert_forward(params, input_ids, token_type_ids, attention_mask, cfg):
    B, S = input_ids.shape
    nh = cfg["heads"]

    # Embedding lookups (gathers) stay in XLA glue; LayerNorm is Pallas.
    # TODO(synk): embedding gather has no clean small-Pallas equivalent; left in XLA.
    emb = (params["word_emb"][input_ids]
           + params["pos_emb"][jnp.arange(S)][None, :, :]
           + params["type_emb"][token_type_ids])
    x = embedding_layernorm(emb, params["emb_ln_g"], params["emb_ln_b"])

    # Rank-1 additive mask, HF-style; broadcast to [S,S] inside the kernel.
    amask = ((1.0 - attention_mask.astype(jnp.float32)) * -10000.0)[:, None, :]

    for lw in params["layers"]:
        x = encoder_layer(x, amask, lw, nh=nh)

    logits = pooler_classifier(x[:, 0, :], params["pool_w"], params["pool_b"],
                               params["cls_w"], params["cls_b"])
    return logits  # [B, num_labels]


if __name__ == "__main__":
    key = jax.random.PRNGKey(0)
    kp, kid, ktt = jax.random.split(key, 3)

    B, S = 2, 8
    params = init_params(kp, CFG)
    input_ids = jax.random.randint(kid, (B, S), 0, CFG["vocab"], dtype=jnp.int32)
    token_type_ids = jax.random.randint(ktt, (B, S), 0, CFG["type_vocab"],
                                        dtype=jnp.int32)
    attention_mask = jnp.ones((B, S), jnp.int32)

    fwd = jax.jit(functools.partial(bert_forward, cfg=CFG))
    logits = fwd(params, input_ids, token_type_ids, attention_mask)
    logits = jax.block_until_ready(logits)
    assert logits.shape == (B, CFG["num_labels"])
    assert bool(jnp.all(jnp.isfinite(logits)))
    print("KERNEL_OK")
</pallas_src>

<mosaic_0001>
module attributes {stable_mosaic.version = 11 : i64} {
  func.func @_head_kernel(%arg0: memref<2x32xf32, #tpu.memory_space<vmem>>, %arg1: memref<32x32xf32, #tpu.memory_space<vmem>>, %arg2: memref<1x32xf32, #tpu.memory_space<vmem>>, %arg3: memref<32x3xf32, #tpu.memory_space<vmem>>, %arg4: memref<1x3xf32, #tpu.memory_space<vmem>>, %arg5: memref<2x3xf32, #tpu.memory_space<vmem>>) attributes {dimension_semantics = [], scalar_prefetch = 0 : i64, scratch_operands = 0 : i64, tpu.core_type = #tpu.core_type<tc>} {
    %c0 = arith.constant 0 : index
    %c0_0 = arith.constant 0 : index
    %0 = vector.load %arg0[%c0, %c0_0] : memref<2x32xf32, #tpu.memory_space<vmem>>, vector<2x32xf32>
    %c0_1 = arith.constant 0 : index
    %c0_2 = arith.constant 0 : index
    %1 = vector.load %arg1[%c0_1, %c0_2] : memref<32x32xf32, #tpu.memory_space<vmem>>, vector<32x32xf32>
    %cst = arith.constant dense<0.000000e+00> : vector<2x32xf32>
    %2 = tpu.matmul %0, %1, %cst {dimension_numbers = #tpu.dot_dimension_numbers<[1], [0], [0], [1], [0, 0, 1, 1], [], []>} : vector<2x32xf32>, vector<32x32xf32>, vector<2x32xf32> -> vector<2x32xf32>
    %c0_3 = arith.constant 0 : index
    %c0_4 = arith.constant 0 : index
    %3 = vector.load %arg2[%c0_3, %c0_4] : memref<1x32xf32, #tpu.memory_space<vmem>>, vector<1x32xf32>
    %4 = vector.broadcast %3 : vector<1x32xf32> to vector<2x32xf32>
    %5 = arith.addf %2, %4 : vector<2x32xf32>
    %6 = math.tanh %5 : vector<2x32xf32>
    %c0_5 = arith.constant 0 : index
    %c0_6 = arith.constant 0 : index
    %7 = vector.load %arg3[%c0_5, %c0_6] : memref<32x3xf32, #tpu.memory_space<vmem>>, vector<32x3xf32>
    %cst_7 = arith.constant dense<0.000000e+00> : vector<2x3xf32>
    %8 = tpu.matmul %6, %7, %cst_7 {dimension_numbers = #tpu.dot_dimension_numbers<[1], [0], [0], [1], [0, 0, 1, 1], [], []>} : vector<2x32xf32>, vector<32x3xf32>, vector<2x3xf32> -> vector<2x3xf32>
    %c0_8 = arith.constant 0 : index
    %c0_9 = arith.constant 0 : index
    %9 = vector.load %arg4[%c0_8, %c0_9] : memref<1x3xf32, #tpu.memory_space<vmem>>, vector<1x3xf32>
    %10 = vector.broadcast %9 : vector<1x3xf32> to vector<2x3xf32>
    %11 = arith.addf %8, %10 : vector<2x3xf32>
    %c0_10 = arith.constant 0 : index
    %c0_11 = arith.constant 0 : index
    %12 = vector.load %arg5[%c0_10, %c0_11] : memref<2x3xf32, #tpu.memory_space<vmem>>, vector<2x3xf32>
    tpu.vector_store %arg5[%c0_10, %c0_11], %11 {strides = array<i32>} : memref<2x3xf32, #tpu.memory_space<vmem>>, vector<2x3xf32>,
    return
  }
}

module attributes {stable_mosaic.version = 11 : i64} {
  func.func @_emb_ln_kernel(%arg0: i32, %arg1: memref<1x8x32xf32, #tpu.memory_space<vmem>>, %arg2: memref<1x32xf32, #tpu.memory_space<vmem>>, %arg3: memref<1x32xf32, #tpu.memory_space<vmem>>, %arg4: memref<1x8x32xf32, #tpu.memory_space<vmem>>) attributes {dimension_semantics = [#tpu.dimension_semantics<parallel>], iteration_bounds = array<i64: 2>, scalar_prefetch = 0 : i64, scratch_operands = 0 : i64, tpu.core_type = #tpu.core_type<tc>, window_params = [{transform_indices = @transform_0, window_bounds = array<i64: 1, 8, 32>}, {pipeline_mode = #tpu.pipeline_mode<synchronous>, transform_indices = @transform_1, window_bounds = array<i64: 1, 32>}, {pipeline_mode = #tpu.pipeline_mode<synchronous>, transform_indices = @transform_2, window_bounds = array<i64: 1, 32>}, {transform_indices = @transform_3, window_bounds = array<i64: 1, 8, 32>}]} {
    %c0 = arith.constant 0 : index
    %c0_0 = arith.constant 0 : index
    %c0_1 = arith.constant 0 : index
    %0 = vector.load %arg1[%c0, %c0_0, %c0_1] : memref<1x8x32xf32, #tpu.memory_space<vmem>>, vector<1x8x32xf32>
    %1 = vector.shape_cast %0 : vector<1x8x32xf32> to vector<8x32xf32>
    %c0_2 = arith.constant 0 : index
    %c0_3 = arith.constant 0 : index
    %2 = vector.load %arg2[%c0_2, %c0_3] : memref<1x32xf32, #tpu.memory_space<vmem>>, vector<1x32xf32>
    %c0_4 = arith.constant 0 : index
    %c0_5 = arith.constant 0 : index
    %3 = vector.load %arg3[%c0_4, %c0_5] : memref<1x32xf32, #tpu.memory_space<vmem>>, vector<1x32xf32>
    %cst = arith.constant dense<0.000000e+00> : vector<8xf32>
    %4 = vector.multi_reduction <add>, %1, %cst [1] : vector<8x32xf32> to vector<8xf32>
    %5 = vector.shape_cast %4 : vector<8xf32> to vector<8x1xf32>
    %cst_6 = arith.constant 3.200000e+01 : f32
    %6 = vector.broadcast %cst_6 : f32 to vector<8x1xf32>
    %7 = arith.divf %5, %6 : vector<8x1xf32>
    %8 = vector.broadcast %7 : vector<8x1xf32> to vector<8x32xf32>
    %9 = arith.subf %1, %8 : vector<8x32xf32>
    %10 = arith.mulf %9, %9 : vector<8x32xf32>
    %cst_7 = arith.constant dense<0.000000e+00> : vector<8xf32>
    %11 = vector.multi_reduction <add>, %10, %cst_7 [1] : vector<8x32xf32> to vector<8xf32>
    %12 = vector.shape_cast %11 : vector<8xf32> to vector<8x1xf32>
    %cst_8 = arith.constant 3.200000e+01 : f32
    %13 = vector.broadcast %cst_8 : f32 to vector<8x1xf32>
    %14 = arith.divf %12, %13 : vector<8x1xf32>
    %cst_9 = arith.constant 9.99999996E-13 : f32
    %15 = vector.broadcast %cst_9 : f32 to vector<8x1xf32>
    %16 = arith.addf %14, %15 : vector<8x1xf32>
    %17 = math.rsqrt %16 : vector<8x1xf32>
    %18 = vector.broadcast %17 : vector<8x1xf32> to vector<8x32xf32>
    %19 = arith.mulf %9, %18 : vector<8x32xf32>
    %20 = vector.broadcast %2 : vector<1x32xf32> to vector<8x32xf32>
    %21 = arith.mulf %19, %20 : vector<8x32xf32>
    %22 = vector.broadcast %3 : vector<1x32xf32> to vector<8x32xf32>
    %23 = arith.addf %21, %22 : vector<8x32xf32>
    %c0_10 = arith.constant 0 : index
    %c0_11 = arith.constant 0 : index
    %c0_12 = arith.constant 0 : index
    %24 = vector.load %arg4[%c0_10, %c0_11, %c0_12] : memref<1x8x32xf32, #tpu.memory_space<vmem>>, vector<1x8x32xf32>
    %25 = vector.shape_cast %24 : vector<1x8x32xf32> to vector<8x32xf32>
    %26 = vector.shape_cast %23 : vector<8x32xf32> to vector<1x8x32xf32>
    tpu.vector_store %arg4[%c0_10, %c0_11, %c0_12], %26 {strides = array<i32>} : memref<1x8x32xf32, #tpu.memory_space<vmem>>, vector<1x8x32xf32>,
    return
  }
  func.func @transform_0(%arg0: i32) -> (i32, i32, i32) {
    %c0_i32 = arith.constant 0 : i32
    %c0_i32_0 = arith.constant 0 : i32
    %c0_i32_1 = arith.constant 0 : i32
    return %arg0, %c0_i32, %c0_i32_0 : i32, i32, i32
  }
  func.func @transform_1(%arg0: i32) -> (i32, i32) {
    %c0_i32 = arith.constant 0 : i32
    %c0_i32_0 = arith.constant 0 : i32
    %c0_i32_1 = arith.constant 0 : i32
    return %c0_i32, %c0_i32_0 : i32, i32
  }
  func.func @transform_2(%arg0: i32) -> (i32, i32) {
    %c0_i32 = arith.constant 0 : i32
    %c0_i32_0 = arith.constant 0 : i32
    %c0_i32_1 = arith.constant 0 : i32
    return %c0_i32, %c0_i32_0 : i32, i32
  }
  func.func @transform_3(%arg0: i32) -> (i32, i32, i32) {
    %c0_i32 = arith.constant 0 : i32
    %c0_i32_0 = arith.constant 0 : i32
    %c0_i32_1 = arith.constant 0 : i32
    return %arg0, %c0_i32, %c0_i32_0 : i32, i32, i32
  }
}

module attributes {stable_mosaic.version = 11 : i64} {
  func.func @_layer_kernel(%arg0: i32, %arg1: memref<1x8x32xf32, #tpu.memory_space<vmem>>, %arg2: memref<1x1x8xf32, #tpu.memory_space<vmem>>, %arg3: memref<32x96xbf16, #tpu.memory_space<vmem>>, %arg4: memref<1x96xf32, #tpu.memory_space<vmem>>, %arg5: memref<32x32xbf16, #tpu.memory_space<vmem>>, %arg6: memref<1x32xf32, #tpu.memory_space<vmem>>, %arg7: memref<1x32xf32, #tpu.memory_space<vmem>>, %arg8: memref<1x32xf32, #tpu.memory_space<vmem>>, %arg9: memref<32x64xbf16, #tpu.memory_space<vmem>>, %arg10: memref<1x64xf32, #tpu.memory_space<vmem>>, %arg11: memref<64x32xbf16, #tpu.memory_space<vmem>>, %arg12: memref<1x32xf32, #tpu.memory_space<vmem>>, %arg13: memref<1x32xf32, #tpu.memory_space<vmem>>, %arg14: memref<1x32xf32, #tpu.memory_space<vmem>>, %arg15: memref<1x8x32xf32, #tpu.memory_space<vmem>>) attributes {dimension_semantics = [#tpu.dimension_semantics<parallel>], iteration_bounds = array<i64: 2>, scalar_prefetch = 0 : i64, scratch_operands = 0 : i64, tpu.core_type = #tpu.core_type<tc>, window_params = [{transform_indices = @transform_0, window_bounds = array<i64: 1, 8, 32>}, {transform_indices = @transform_1, window_bounds = array<i64: 1, 1, 8>}, {pipeline_mode = #tpu.pipeline_mode<synchronous>, transform_indices = @transform_2, window_bounds = array<i64: 32, 96>}, {pipeline_mode = #tpu.pipeline_mode<synchronous>, transform_indices = @transform_3, window_bounds = array<i64: 1, 96>}, {pipeline_mode = #tpu.pipeline_mode<synchronous>, transform_indices = @transform_4, window_bounds = array<i64: 32, 32>}, {pipeline_mode = #tpu.pipeline_mode<synchronous>, transform_indices = @transform_5, window_bounds = array<i64: 1, 32>}, {pipeline_mode = #tpu.pipeline_mode<synchronous>, transform_indices = @transform_6, window_bounds = array<i64: 1, 32>}, {pipeline_mode = #tpu.pipeline_mode<synchronous>, transform_indices = @transform_7, window_bounds = array<i64: 1, 32>}, {pipeline_mode = #tpu.pipeline_mode<synchronous>, transform_indices = @transform_8, window_bounds = array<i64: 32, 64>}, {pipeline_mode = #tpu.pipeline_mode<synchronous>, transform_indices = @transform_9, window_bounds = array<i64: 1, 64>}, {pipeline_mode = #tpu.pipeline_mode<synchronous>, transform_indices = @transform_10, window_bounds = array<i64: 64, 32>}, {pipeline_mode = #tpu.pipeline_mode<synchronous>, transform_indices = @transform_11, window_bounds = array<i64: 1, 32>}, {pipeline_mode = #tpu.pipeline_mode<synchronous>, transform_indices = @transform_12, window_bounds = array<i64: 1, 32>}, {pipeline_mode = #tpu.pipeline_mode<synchronous>, transform_indices = @transform_13, window_bounds = array<i64: 1, 32>}, {transform_indices = @transform_14, window_bounds = array<i64: 1, 8, 32>}]} {
    %c0 = arith.constant 0 : index
    %c0_0 = arith.constant 0 : index
    %c0_1 = arith.constant 0 : index
    %0 = vector.load %arg1[%c0, %c0_0, %c0_1] : memref<1x8x32xf32, #tpu.memory_space<vmem>>, vector<1x8x32xf32>
    %1 = vector.shape_cast %0 : vector<1x8x32xf32> to vector<8x32xf32>
    %c0_2 = arith.constant 0 : index
    %c0_3 = arith.constant 0 : index
    %c0_4 = arith.constant 0 : index
    %2 = vector.load %arg2[%c0_2, %c0_3, %c0_4] : memref<1x1x8xf32, #tpu.memory_space<vmem>>, vector<1x1x8xf32>
    %3 = vector.shape_cast %2 : vector<1x1x8xf32> to vector<1x8xf32>
    %4 = arith.truncf %1 : vector<8x32xf32> to vector<8x32xbf16>
    %c0_5 = arith.constant 0 : index
    %c0_6 = arith.constant 0 : index
    %5 = vector.load %arg3[%c0_5, %c0_6] : memref<32x96xbf16, #tpu.memory_space<vmem>>, vector<32x96xbf16>
    %cst = arith.constant dense<0.000000e+00> : vector<8x96xf32>
    %6 = tpu.matmul %4, %5, %cst {dimension_numbers = #tpu.dot_dimension_numbers<[1], [0], [0], [1], [0, 0, 1, 1], [], []>} : vector<8x32xbf16>, vector<32x96xbf16>, vector<8x96xf32> -> vector<8x96xf32>
    %c0_7 = arith.constant 0 : index
    %c0_8 = arith.constant 0 : index
    %7 = vector.load %arg4[%c0_7, %c0_8] : memref<1x96xf32, #tpu.memory_space<vmem>>, vector<1x96xf32>
    %8 = vector.broadcast %7 : vector<1x96xf32> to vector<8x96xf32>
    %9 = arith.addf %6, %8 : vector<8x96xf32>
    %10 = vector.extract_strided_slice %9 {offsets = [0, 0], sizes = [8, 16], strides = [1, 1]} : vector<8x96xf32> to vector<8x16xf32>
    %11 = arith.truncf %10 : vector<8x16xf32> to vector<8x16xbf16>
    %12 = vector.extract_strided_slice %9 {offsets = [0, 32], sizes = [8, 16], strides = [1, 1]} : vector<8x96xf32> to vector<8x16xf32>
    %13 = arith.truncf %12 : vector<8x16xf32> to vector<8x16xbf16>
    %14 = vector.extract_strided_slice %9 {offsets = [0, 64], sizes = [8, 16], strides = [1, 1]} : vector<8x96xf32> to vector<8x16xf32>
    %15 = arith.truncf %14 : vector<8x16xf32> to vector<8x16xbf16>
    "tpu.trace_start"() <{level = 10 : i32, message = "qd,kd->qk"}> : () -> ()
    %cst_9 = arith.constant dense<0.000000e+00> : vector<8x8xf32>
    %16 = tpu.matmul %11, %13, %cst_9 {dimension_numbers = #tpu.dot_dimension_numbers<[1], [1], [0], [0], [0, 0, 1, 0], [], []>} : vector<8x16xbf16>, vector<8x16xbf16>, vector<8x8xf32> -> vector<8x8xf32>
    "tpu.trace_stop"() : () -> ()
    %cst_10 = arith.constant 2.500000e-01 : f32
    %17 = vector.broadcast %cst_10 : f32 to vector<8x8xf32>
    %18 = arith.mulf %16, %17 : vector<8x8xf32>
    %19 = vector.broadcast %3 : vector<1x8xf32> to vector<8x8xf32>
    %20 = arith.addf %18, %19 : vector<8x8xf32>
    %cst_11 = arith.constant dense<0xFF800000> : vector<8xf32>
    %21 = vector.multi_reduction <maximumf>, %20, %cst_11 [1] : vector<8x8xf32> to vector<8xf32>
    %22 = vector.shape_cast %21 : vector<8xf32> to vector<8x1xf32>
    %23 = vector.broadcast %22 : vector<8x1xf32> to vector<8x8xf32>
    %24 = arith.subf %20, %23 : vector<8x8xf32>
    %25 = math.exp %24 : vector<8x8xf32>
    %cst_12 = arith.constant dense<0.000000e+00> : vector<8xf32>
    %26 = vector.multi_reduction <add>, %25, %cst_12 [1] : vector<8x8xf32> to vector<8xf32>
    %27 = vector.shape_cast %26 : vector<8xf32> to vector<8x1xf32>
    %28 = tpu.reciprocal %27 {approx = true} : vector<8x1xf32> -> vector<8x1xf32>
    %29 = vector.broadcast %28 : vector<8x1xf32> to vector<8x8xf32>
    %30 = arith.mulf %25, %29 : vector<8x8xf32>
    %31 = arith.truncf %30 : vector<8x8xf32> to vector<8x8xbf16>
    %cst_13 = arith.constant dense<0.000000e+00> : vector<8x16xf32>
    %32 = tpu.matmul %31, %15, %cst_13 {dimension_numbers = #tpu.dot_dimension_numbers<[1], [0], [0], [1], [0, 0, 1, 1], [], []>} : vector<8x8xbf16>, vector<8x16xbf16>, vector<8x16xf32> -> vector<8x16xf32>
    %33 = vector.extract_strided_slice %9 {offsets = [0, 16], sizes = [8, 16], strides = [1, 1]} : vector<8x96xf32> to vector<8x16xf32>
    %34 = arith.truncf %33 : vector<8x16xf32> to vector<8x16xbf16>
    %35 = vector.extract_strided_slice %9 {offsets = [0, 48], sizes = [8, 16], strides = [1, 1]} : vector<8x96xf32> to vector<8x16xf32>
    %36 = arith.truncf %35 : vector<8x16xf32> to vector<8x16xbf16>
    %37 = vector.extract_strided_slice %9 {offsets = [0, 80], sizes = [8, 16], strides = [1, 1]} : vector<8x96xf32> to vector<8x16xf32>
    %38 = arith.truncf %37 : vector<8x16xf32> to vector<8x16xbf16>
    "tpu.trace_start"() <{level = 10 : i32, message = "qd,kd->qk"}> : () -> ()
    %cst_14 = arith.constant dense<0.000000e+00> : vector<8x8xf32>
    %39 = tpu.matmul %34, %36, %cst_14 {dimension_numbers = #tpu.dot_dimension_numbers<[1], [1], [0], [0], [0, 0, 1, 0], [], []>} : vector<8x16xbf16>, vector<8x16xbf16>, vector<8x8xf32> -> vector<8x8xf32>
    "tpu.trace_stop"() : () -> ()
    %cst_15 = arith.constant 2.500000e-01 : f32
    %40 = vector.broadcast %cst_15 : f32 to vector<8x8xf32>
    %41 = arith.mulf %39, %40 : vector<8x8xf32>
    %42 = vector.broadcast %3 : vector<1x8xf32> to vector<8x8xf32>
    %43 = arith.addf %41, %42 : vector<8x8xf32>
    %cst_16 = arith.constant dense<0xFF800000> : vector<8xf32>
    %44 = vector.multi_reduction <maximumf>, %43, %cst_16 [1] : vector<8x8xf32> to vector<8xf32>
    %45 = vector.shape_cast %44 : vector<8xf32> to vector<8x1xf32>
    %46 = vector.broadcast %45 : vector<8x1xf32> to vector<8x8xf32>
    %47 = arith.subf %43, %46 : vector<8x8xf32>
    %48 = math.exp %47 : vector<8x8xf32>
    %cst_17 = arith.constant dense<0.000000e+00> : vector<8xf32>
    %49 = vector.multi_reduction <add>, %48, %cst_17 [1] : vector<8x8xf32> to vector<8xf32>
    %50 = vector.shape_cast %49 : vector<8xf32> to vector<8x1xf32>
    %51 = tpu.reciprocal %50 {approx = true} : vector<8x1xf32> -> vector<8x1xf32>
    %52 = vector.broadcast %51 : vector<8x1xf32> to vector<8x8xf32>
    %53 = arith.mulf %48, %52 : vector<8x8xf32>
    %54 = arith.truncf %53 : vector<8x8xf32> to vector<8x8xbf16>
    %cst_18 = arith.constant dense<0.000000e+00> : vector<8x16xf32>
    %55 = tpu.matmul %54, %38, %cst_18 {dimension_numbers = #tpu.dot_dimension_numbers<[1], [0], [0], [1], [0, 0, 1, 1], [], []>} : vector<8x8xbf16>, vector<8x16xbf16>, vector<8x16xf32> -> vector<8x16xf32>
    %56 = tpu.concatenate %32, %55 in 1 : vector<8x16xf32>, vector<8x16xf32> -> vector<8x32xf32>
    %57 = arith.truncf %56 : vector<8x32xf32> to vector<8x32xbf16>
    %c0_19 = arith.constant 0 : index
    %c0_20 = arith.constant 0 : index
    %58 = vector.load %arg5[%c0_19, %c0_20] : memref<32x32xbf16, #tpu.memory_space<vmem>>, vector<32x32xbf16>
    %cst_21 = arith.constant dense<0.000000e+00> : vector<8x32xf32>
    %59 = tpu.matmul %57, %58, %cst_21 {dimension_numbers = #tpu.dot_dimension_numbers<[1], [0], [0], [1], [0, 0, 1, 1], [], []>} : vector<8x32xbf16>, vector<32x32xbf16>, vector<8x32xf32> -> vector<8x32xf32>
    %c0_22 = arith.constant 0 : index
    %c0_23 = arith.constant 0 : index
    %60 = vector.load %arg6[%c0_22, %c0_23] : memref<1x32xf32, #tpu.memory_space<vmem>>, vector<1x32xf32>
    %61 = vector.broadcast %60 : vector<1x32xf32> to vector<8x32xf32>
    %62 = arith.addf %59, %61 : vector<8x32xf32>
    %63 = arith.addf %62, %1 : vector<8x32xf32>
    %c0_24 = arith.constant 0 : index
    %c0_25 = arith.constant 0 : index
    %64 = vector.load %arg7[%c0_24, %c0_25] : memref<1x32xf32, #tpu.memory_space<vmem>>, vector<1x32xf32>
    %c0_26 = arith.constant 0 : index
    %c0_27 = arith.constant 0 : index
    %65 = vector.load %arg8[%c0_26, %c0_27] : memref<1x32xf32, #tpu.memory_space<vmem>>, vector<1x32xf32>
    %cst_28 = arith.constant dense<0.000000e+00> : vector<8xf32>
    %66 = vector.multi_reduction <add>, %63, %cst_28 [1] : vector<8x32xf32> to vector<8xf32>
    %67 = vector.shape_cast %66 : vector<8xf32> to vector<8x1xf32>
    %cst_29 = arith.constant 3.200000e+01 : f32
    %68 = vector.broadcast %cst_29 : f32 to vector<8x1xf32>
    %69 = arith.divf %67, %68 : vector<8x1xf32>
    %70 = vector.broadcast %69 : vector<8x1xf32> to vector<8x32xf32>
    %71 = arith.subf %63, %70 : vector<8x32xf32>
    %72 = arith.mulf %71, %71 : vector<8x32xf32>
    %cst_30 = arith.constant dense<0.000000e+00> : vector<8xf32>
    %73 = vector.multi_reduction <add>, %72, %cst_30 [1] : vector<8x32xf32> to vector<8xf32>
    %74 = vector.shape_cast %73 : vector<8xf32> to vector<8x1xf32>
    %cst_31 = arith.constant 3.200000e+01 : f32
    %75 = vector.broadcast %cst_31 : f32 to vector<8x1xf32>
    %76 = arith.divf %74, %75 : vector<8x1xf32>
    %cst_32 = arith.constant 9.99999996E-13 : f32
    %77 = vector.broadcast %cst_32 : f32 to vector<8x1xf32>
    %78 = arith.addf %76, %77 : vector<8x1xf32>
    %79 = math.rsqrt %78 : vector<8x1xf32>
    %80 = vector.broadcast %79 : vector<8x1xf32> to vector<8x32xf32>
    %81 = arith.mulf %71, %80 : vector<8x32xf32>
    %82 = vector.broadcast %64 : vector<1x32xf32> to vector<8x32xf32>
    %83 = arith.mulf %81, %82 : vector<8x32xf32>
    %84 = vector.broadcast %65 : vector<1x32xf32> to vector<8x32xf32>
    %85 = arith.addf %83, %84 : vector<8x32xf32>
    %86 = arith.truncf %85 : vector<8x32xf32> to vector<8x32xbf16>
    %c0_33 = arith.constant 0 : index
    %c0_34 = arith.constant 0 : index
    %87 = vector.load %arg9[%c0_33, %c0_34] : memref<32x64xbf16, #tpu.memory_space<vmem>>, vector<32x64xbf16>
    %cst_35 = arith.constant dense<0.000000e+00> : vector<8x64xf32>
    %88 = tpu.matmul %86, %87, %cst_35 {dimension_numbers = #tpu.dot_dimension_numbers<[1], [0], [0], [1], [0, 0, 1, 1], [], []>} : vector<8x32xbf16>, vector<32x64xbf16>, vector<8x64xf32> -> vector<8x64xf32>
    %c0_36 = arith.constant 0 : index
    %c0_37 = arith.constant 0 : index
    %89 = vector.load %arg10[%c0_36, %c0_37] : memref<1x64xf32, #tpu.memory_space<vmem>>, vector<1x64xf32>
    %90 = vector.broadcast %89 : vector<1x64xf32> to vector<8x64xf32>
    %91 = arith.addf %88, %90 : vector<8x64xf32>
    %cst_38 = arith.constant 5.000000e-01 : f32
    %92 = vector.broadcast %cst_38 : f32 to vector<8x64xf32>
    %93 = arith.mulf %92, %91 : vector<8x64xf32>
    %cst_39 = arith.constant 4.471500e-02 : f32
    %94 = vector.broadcast %cst_39 : f32 to vector<8x64xf32>
    %95 = arith.mulf %94, %91 : vector<8x64xf32>
    %96 = arith.mulf %95, %91 : vector<8x64xf32>
    %97 = arith.mulf %96, %91 : vector<8x64xf32>
    %98 = arith.addf %91, %97 : vector<8x64xf32>
    %cst_40 = arith.constant 0.797884583 : f32
    %99 = vector.broadcast %cst_40 : f32 to vector<8x64xf32>
    %100 = arith.mulf %99, %98 : vector<8x64xf32>
    %101 = math.tanh %100 : vector<8x64xf32>
    %cst_41 = arith.constant 1.000000e+00 : f32
    %102 = vector.broadcast %cst_41 : f32 to vector<8x64xf32>
    %103 = arith.addf %102, %101 : vector<8x64xf32>
    %104 = arith.mulf %93, %103 : vector<8x64xf32>
    %105 = arith.truncf %104 : vector<8x64xf32> to vector<8x64xbf16>
    %c0_42 = arith.constant 0 : index
    %c0_43 = arith.constant 0 : index
    %106 = vector.load %arg11[%c0_42, %c0_43] : memref<64x32xbf16, #tpu.memory_space<vmem>>, vector<64x32xbf16>
    %cst_44 = arith.constant dense<0.000000e+00> : vector<8x32xf32>
    %107 = tpu.matmul %105, %106, %cst_44 {dimension_numbers = #tpu.dot_dimension_numbers<[1], [0], [0], [1], [0, 0, 1, 1], [], []>} : vector<8x64xbf16>, vector<64x32xbf16>, vector<8x32xf32> -> vector<8x32xf32>
    %c0_45 = arith.constant 0 : index
    %c0_46 = arith.constant 0 : index
    %108 = vector.load %arg12[%c0_45, %c0_46] : memref<1x32xf32, #tpu.memory_space<vmem>>, vector<1x32xf32>
    %109 = vector.broadcast %108 : vector<1x32xf32> to vector<8x32xf32>
    %110 = arith.addf %107, %109 : vector<8x32xf32>
    %111 = arith.addf %110, %85 : vector<8x32xf32>
    %c0_47 = arith.constant 0 : index
    %c0_48 = arith.constant 0 : index
    %112 = vector.load %arg13[%c0_47, %c0_48] : memref<1x32xf32, #tpu.memory_space<vmem>>, vector<1x32xf32>
    %c0_49 = arith.constant 0 : index
    %c0_50 = arith.constant 0 : index
    %113 = vector.load %arg14[%c0_49, %c0_50] : memref<1x32xf32, #tpu.memory_space<vmem>>, vector<1x32xf32>
    %cst_51 = arith.constant dense<0.000000e+00> : vector<8xf32>
    %114 = vector.multi_reduction <add>, %111, %cst_51 [1] : vector<8x32xf32> to vector<8xf32>
    %115 = vector.shape_cast %114 : vector<8xf32> to vector<8x1xf32>
    %cst_52 = arith.constant 3.200000e+01 : f32
    %116 = vector.broadcast %cst_52 : f32 to vector<8x1xf32>
    %117 = arith.divf %115, %116 : vector<8x1xf32>
    %118 = vector.broadcast %117 : vector<8x1xf32> to vector<8x32xf32>
    %119 = arith.subf %111, %118 : vector<8x32xf32>
    %120 = arith.mulf %119, %119 : vector<8x32xf32>
    %cst_53 = arith.constant dense<0.000000e+00> : vector<8xf32>
    %121 = vector.multi_reduction <add>, %120, %cst_53 [1] : vector<8x32xf32> to vector<8xf32>
    %122 = vector.shape_cast %121 : vector<8xf32> to vector<8x1xf32>
    %cst_54 = arith.constant 3.200000e+01 : f32
    %123 = vector.broadcast %cst_54 : f32 to vector<8x1xf32>
    %124 = arith.divf %122, %123 : vector<8x1xf32>
    %cst_55 = arith.constant 9.99999996E-13 : f32
    %125 = vector.broadcast %cst_55 : f32 to vector<8x1xf32>
    %126 = arith.addf %124, %125 : vector<8x1xf32>
    %127 = math.rsqrt %126 : vector<8x1xf32>
    %128 = vector.broadcast %127 : vector<8x1xf32> to vector<8x32xf32>
    %129 = arith.mulf %119, %128 : vector<8x32xf32>
    %130 = vector.broadcast %112 : vector<1x32xf32> to vector<8x32xf32>
    %131 = arith.mulf %129, %130 : vector<8x32xf32>
    %132 = vector.broadcast %113 : vector<1x32xf32> to vector<8x32xf32>
    %133 = arith.addf %131, %132 : vector<8x32xf32>
    %c0_56 = arith.constant 0 : index
    %c0_57 = arith.constant 0 : index
    %c0_58 = arith.constant 0 : index
    %134 = vector.load %arg15[%c0_56, %c0_57, %c0_58] : memref<1x8x32xf32, #tpu.memory_space<vmem>>, vector<1x8x32xf32>
    %135 = vector.shape_cast %134 : vector<1x8x32xf32> to vector<8x32xf32>
    %136 = vector.shape_cast %133 : vector<8x32xf32> to vector<1x8x32xf32>
    tpu.vector_store %arg15[%c0_56, %c0_57, %c0_58], %136 {strides = array<i32>} : memref<1x8x32xf32, #tpu.memory_space<vmem>>, vector<1x8x32xf32>,
    return
  }
  func.func @transform_0(%arg0: i32) -> (i32, i32, i32) {
    %c0_i32 = arith.constant 0 : i32
    %c0_i32_0 = arith.constant 0 : i32
    %c0_i32_1 = arith.constant 0 : i32
    return %arg0, %c0_i32, %c0_i32_0 : i32, i32, i32
  }
  func.func @transform_1(%arg0: i32) -> (i32, i32, i32) {
    %c0_i32 = arith.constant 0 : i32
    %c0_i32_0 = arith.constant 0 : i32
    %c0_i32_1 = arith.constant 0 : i32
    return %arg0, %c0_i32, %c0_i32_0 : i32, i32, i32
  }
  func.func @transform_2(%arg0: i32) -> (i32, i32) {
    %c0_i32 = arith.constant 0 : i32
    %c0_i32_0 = arith.constant 0 : i32
    %c0_i32_1 = arith.constant 0 : i32
    return %c0_i32, %c0_i32_0 : i32, i32
  }
  func.func @transform_3(%arg0: i32) -> (i32, i32) {
    %c0_i32 = arith.constant 0 : i32
    %c0_i32_0 = arith.constant 0 : i32
    %c0_i32_1 = arith.constant 0 : i32
    return %c0_i32, %c0_i32_0 : i32, i32
  }
  func.func @transform_4(%arg0: i32) -> (i32, i32) {
    %c0_i32 = arith.constant 0 : i32
    %c0_i32_0 = arith.constant 0 : i32
    %c0_i32_1 = arith.constant 0 : i32
    return %c0_i32, %c0_i32_0 : i32, i32
  }
  func.func @transform_5(%arg0: i32) -> (i32, i32) {
    %c0_i32 = arith.constant 0 : i32
    %c0_i32_0 = arith.constant 0 : i32
    %c0_i32_1 = arith.constant 0 : i32
    return %c0_i32, %c0_i32_0 : i32, i32
  }
  func.func @transform_6(%arg0: i32) -> (i32, i32) {
    %c0_i32 = arith.constant 0 : i32
    %c0_i32_0 = arith.constant 0 : i32
    %c0_i32_1 = arith.constant 0 : i32
    return %c0_i32, %c0_i32_0 : i32, i32
  }
  func.func @transform_7(%arg0: i32) -> (i32, i32) {
    %c0_i32 = arith.constant 0 : i32
    %c0_i32_0 = arith.constant 0 : i32
    %c0_i32_1 = arith.constant 0 : i32
    return %c0_i32, %c0_i32_0 : i32, i32
  }
  func.func @transform_8(%arg0: i32) -> (i32, i32) {
    %c0_i32 = arith.constant 0 : i32
    %c0_i32_0 = arith.constant 0 : i32
    %c0_i32_1 = arith.constant 0 : i32
    return %c0_i32, %c0_i32_0 : i32, i32
  }
  func.func @transform_9(%arg0: i32) -> (i32, i32) {
    %c0_i32 = arith.constant 0 : i32
    %c0_i32_0 = arith.constant 0 : i32
    %c0_i32_1 = arith.constant 0 : i32
    return %c0_i32, %c0_i32_0 : i32, i32
  }
  func.func @transform_10(%arg0: i32) -> (i32, i32) {
    %c0_i32 = arith.constant 0 : i32
    %c0_i32_0 = arith.constant 0 : i32
    %c0_i32_1 = arith.constant 0 : i32
    return %c0_i32, %c0_i32_0 : i32, i32
  }
  func.func @transform_11(%arg0: i32) -> (i32, i32) {
    %c0_i32 = arith.constant 0 : i32
    %c0_i32_0 = arith.constant 0 : i32
    %c0_i32_1 = arith.constant 0 : i32
    return %c0_i32, %c0_i32_0 : i32, i32
  }
  func.func @transform_12(%arg0: i32) -> (i32, i32) {
    %c0_i32 = arith.constant 0 : i32
    %c0_i32_0 = arith.constant 0 : i32
    %c0_i32_1 = arith.constant 0 : i32
    return %c0_i32, %c0_i32_0 : i32, i32
  }
  func.func @transform_13(%arg0: i32) -> (i32, i32) {
    %c0_i32 = arith.constant 0 : i32
    %c0_i32_0 = arith.constant 0 : i32
    %c0_i32_1 = arith.constant 0 : i32
    return %c0_i32, %c0_i32_0 : i32, i32
  }
  func.func @transform_14(%arg0: i32) -> (i32, i32, i32) {
    %c0_i32 = arith.constant 0 : i32
    %c0_i32_0 = arith.constant 0 : i32
    %c0_i32_1 = arith.constant 0 : i32
    return %arg0, %c0_i32, %c0_i32_0 : i32, i32, i32
  }
}

</mosaic_0001>

<bundles_post_ra>
// kernel: bert_forward.7
= control target key start
LH: loop header
LB: loop body
LE: loop exit
PB: predicated region body
PF: predicated region fallthrough
CT: control target
= control target key end

     0   :  { %v286_v3 = vmov 0.0|0.0   ;;  %vm287_vm0 = vmmov 0   ;;  %v288_v6 = vmov 0.0   ;;  %s367_s0 = inlined_call_operand.vmem [shape: f32[2,32], index: 0, kind: input, shape index: {}]   ;;  %s368_s1 = inlined_call_operand.vmem [shape: f32[32,32], index: 1, kind: input, shape index: {}]   ;;  %s369_s2 = inlined_call_operand.vmem [shape: f32[1,32], index: 2, kind: input, shape index: {}]   ;;  %s370_s3 = inlined_call_operand.vmem [shape: f32[32,3], index: 3, kind: input, shape index: {}]   ;;  %s371_s4 = inlined_call_operand.vmem [shape: f32[1,3], index: 4, kind: input, shape index: {}]   ;;  %s372_s5 = inlined_call_operand.hbm [shape: f32[2,3], index: 5, kind: output, shape index: {}]  }
   0x1   :  { %v22_v0 = vld [vmem:[%s368_s1] sm:$0xff]  ;;  %v23_v1 = vld [vmem:[%s368_s1 + $0x8] sm:$0xff]  ;;  %v24_v2 = vld [vmem:[%s368_s1 + $0x10] sm:$0xff]  ;;  %244 = vmatprep.subr.bf16.mxu0 %v286_v3  ;;  %230 = vmatprep.mubr.msk.f32.mxu0 %vm287_vm0, %v288_v6 }
   0x2   :  { %v245_v4 = vpack.c.bf16 %v23_v1, %v22_v0  ;;  %v25_v5 = vld [vmem:[%s368_s1 + $0x18] sm:$0xff]  ;;  %250 = vmatprep.subr.bf16.mxu1 %v286_v3  ;;  %241 = vmatprep.mubr.msk.f32.mxu1 %vm287_vm0, %v288_v6 }
   0x3   :  { %10 = vsyncpa [#allocation3], 0  ;;  %v248_v7 = vpack.c.bf16 %v25_v5, %v24_v2  ;;  %v21_v8 = vld [vmem:[%s367_s0] sm:$0x3]  ;;  %vm33_vm1 = vcmask 261120   ;;  %v109_v10 = vld [vmem:[%s370_s3 + $0x8] sm:$0xff] }
   0x4   :  { %246 = vmatpush3.bf16.msra.mxu0 %v245_v4  ;;  %v108_v9 = vld [vmem:[%s370_s3] sm:$0xff]  ;;  %v110_v11 = vld [vmem:[%s370_s3 + $0x10] sm:$0xff]  ;;  %v111_v13 = vld [vmem:[%s370_s3 + $0x18] sm:$0xff]  ;;  %s289_s3 = smov [#allocation2]   ;;  %vm192_vm2 = vcmask 17408  }
   0x5   :  { %247 = vmatprep.subr.bf16.mxu0 %v286_v3  ;;  %v251_v12 = vpack.c.bf16 %v109_v10, %v108_v9  ;;  %v254_v14 = vpack.c.bf16 %v111_v13, %v110_v11  ;;  %v208_v15 = vld [vmem:[%s369_s2] ss:$0 sm:$0xff]  ;;  %s200_s13 = sshll.u32 %s289_s3, 4  ;;  %s201_s13 = int_to_ptr.vmem [resolvable:$true] %s200_s13 }
   0x6   :  { %v210_v20 = vld [vmem:[%s371_s4] ss:$0 sm:$0xff]  ;;  %s262_s2 = scalar_lea.vmem %s201_s13, 32  ;;  %p267_p1 = scmp.lt.s32.totalorder %s201_s13, %s201_s13 }
   0x7   :  { %252 = vmatpush3.bf16.msra.mxu1 %v251_v12  ;;  %p263_p0 = scmp.ne.s32.totalorder %s201_s13, %s262_s2  ;;  %p268_p2 = scmp.lt.s32.totalorder %s262_s2, %s262_s2 }
   0x8   :  { %249 = vmatpush3.bf16.msra.mxu0 %v248_v7  ;;  %253 = vmatprep.subr.bf16.mxu1 %v286_v3 }
   0x9   :  { %p269_p3 = por %p268_p2, %p267_p1 }
   0xb   :  { %231 = vmatmul.mubr.msk.f32.vlgmr.msra.gmra.mrb[0].mxu0 %vm33_vm1, %v21_v8  ;;  %255 = vmatpush3.bf16.msra.mxu1 %v254_v14  ;;  %p270_p4 = pnand %p269_p3, %p263_p0 }
  0xde   :  { %v103_v16 = vpop.f32.mrb[0].mxu0 }
  0xdf   :  { %v104_v17 = vadd.f32 %v208_v15, %v103_v16  ;;  %v232_v18 = vpop.f32.mrb[1].mxu0 }
  0xe1   :  { %260 = vtanh.f32 %v104_v17 }
  0xeb   :  { %v261_v19 = vpop.eup %260 }
  0xec   :  { %242 = vmatmul.mubr.msk.f32.vlgmr.msra.gmra.mrb[0].mxu1 %vm33_vm1, %v261_v19 }
 0x1bf   :  { %v188_v21 = vpop.f32.mrb[0].mxu1 }
 0x1c0   :  { %v189_v22 = vadd.f32 %v210_v20, %v188_v21  ;;  %v243_v23 = vpop.f32.mrb[1].mxu1 }
 0x1c2   :  { %193 = vst.msk [vmem:[#allocation2] sm:$0x3] %vm192_vm2, %v189_v22 }
 0x1c3   :  { %273 = shalt.err (!%p270_p4)
}
 0x1c4   :  { %s274_s16 = scalar_lea.hbm %s372_s5, 32 }
 0x1c5   :  { %p275_p5 = scmp.ne.s32.totalorder %s372_s5, %s274_s16  ;;  %p278_p6 = scmp.lt.u32.totalorder %s274_s16, %s372_s5 }
 0x1c7   :  { %p280_p7 = pnand %p278_p6, %p275_p5 }
 0x1c9   :  { %283 = shalt.err (!%p280_p7)
}
 0x1ca   :  { %203 = dma.vmem_to_hbm [thread:$0]  %s201_s13, 32, %s372_s5, [#allocation3]  }
 0x1cb   :  { %284 = dma.done.wait [#allocation3], 32  }
 0x1cc   :  { %285 = vsyncadd [#allocation3], 4294967264 }
 0x1cd   :  { %207 = vsyncpa [#allocation3], 1 }

// kernel: bert_forward.4
= control target key start
LH: loop header
LB: loop body
LE: loop exit
PB: predicated region body
PF: predicated region fallthrough
CT: control target
= control target key end

     0   :  { %s301_s12 = smov 0   ;;  %s327_s0 = inlined_call_operand.vmem [shape: f32[2,8,32], index: 0, kind: input, shape index: {}]   ;;  %s328_s1 = inlined_call_operand.vmem [shape: f32[1,32], index: 1, kind: input, shape index: {}]   ;;  %s329_s2 = inlined_call_operand.vmem [shape: f32[1,32], index: 2, kind: input, shape index: {}]   ;;  %s330_s3 = inlined_call_operand.vmem [shape: f32[2,8,32], index: 3, kind: output, shape index: {}]  }
   0x1 LB: > { %s252_s13 = sadd.s32 4294967295, %s279_s12   ;;  %p256_p0 = scmp.ge.s32.totalorder %s279_s12, 1  ;;  %s279_s12 = sphi %s301_s12, %s13_s12  }
   0x2   : > { %p136_p1 = scmp.lt.s32.totalorder %s279_s12, 3 }
   0x4   : > { %p137_p2 = pnand %p256_p0, %p136_p1 }
   0x5   : > { %p158_p3 = scmp.lt.s32.totalorder (!%p137_p2), %s252_s13, 1  ;;  %vm169_vm0 = vcmask (!%p137_p2), 261120   ;;  %v259_v11 = vld [vmem:[%s328_s1] ss:$0 sm:$0xff] (!%p137_p2) }
   0x6   : > { %140 = sbr.rel (%p137_p2) target bundleno = 331 (0x14b), region = 32  ;;  %v260_v13 = vld [vmem:[%s329_s2] ss:$0 sm:$0xff] (!%p137_p2) }
   0xd   : > { %s332_s13 = smov (!%p158_p3, %s252_s13), 1 }
   0xe   : > { %s257_s14 = sshll.u32 %s332_s13, 3 }
   0xf   : > { %s161_s17 = scalar_lea.vmem %s327_s0, %s257_s14  ;;  %s165_s24 = scalar_lea.vmem %s330_s3, %s257_s14 }
  0x10   : > { %v166_v0 = vld [vmem:[%s161_s17] sm:$0xff] }
  0x11   : > { %v170_v1 = vsel %vm169_vm0, %v166_v0, 0.0 }
  0x12   : > { %171 = vadd.xlane.f32.xlu0 %v170_v1 }
  0x9f   : > { %v172_v2 = vpop.xlane.xlu0 %171 }
  0xa0   : > { %v174_v3 = vmul.f32 0.03125, %v172_v2 }
  0xa2   : > { %v175_v4 = vsub.f32 %v166_v0, %v174_v3 }
  0xa4   : > { %v176_v5 = vmul.f32 %v175_v4, %v175_v4 }
  0xa6   : > { %v177_v6 = vsel %vm169_vm0, %v176_v5, 0.0 }
  0xa7   : > { %178 = vadd.xlane.f32.xlu0 %v177_v6 }
 0x134   : > { %v179_v7 = vpop.xlane.xlu0 %178 }
 0x135   : > { %v180_v8 = vmul.f32 0.03125, %v179_v7 }
 0x137   : > { %v181_v9 = vadd.f32 1e-12, %v180_v8 }
 0x139   : > { %271 = vrsqrt.f32 %v181_v9 }
 0x143   : > { %v272_v10 = vpop.eup %271 }
 0x144   : > { %v183_v12 = vmul.f32 %v272_v10, %v175_v4 }
 0x146   : > { %v190_v14 = vmul.f32 %v259_v11, %v183_v12 }
 0x148   : > { %v197_v15 = vadd.f32 %v260_v13, %v190_v14 }
 0x14a   : > { %198 = vst.msk [vmem:[%s165_s24] sm:$0xff] %vm169_vm0, %v197_v15 }
 0x14b PF: > { %s13_s12 = sadd.s32 1, %s279_s12  }
 0x14c   : > { %p10_p4 = scmp.ge.s32.totalorder %s13_s12, 4  }
 0x14e   :  { %12 = sbr.rel (!%p10_p4) target bundleno = 1 (0x1), region = 62 }

// kernel: bert_forward.5
= control target key start
LH: loop header
LB: loop body
LE: loop exit
PB: predicated region body
PF: predicated region fallthrough
CT: control target
= control target key end

     0   :  { %s1386_s29 = smov 0   ;;  %s1522_s0 = inlined_call_operand.vmem [shape: f32[2,8,32], index: 0, kind: input, shape index: {}]   ;;  %s1523_s1 = inlined_call_operand.vmem [shape: f32[2,1,8], index: 1, kind: input, shape index: {}]   ;;  %s1524_s2 = inlined_call_operand.vmem [shape: bf16[32,96], index: 2, kind: input, shape index: {}]   ;;  %s1525_s3 = inlined_call_operand.vmem [shape: f32[1,96], index: 3, kind: input, shape index: {}]   ;;  %s1526_s4 = inlined_call_operand.vmem [shape: bf16[32,32], index: 4, kind: input, shape index: {}]   ;;  %s1527_s5 = inlined_call_operand.vmem [shape: f32[1,32], index: 5, kind: input, shape index: {}]   ;;  %s1528_s6 = inlined_call_operand.vmem [shape: f32[1,32], index: 6, kind: input, shape index: {}]   ;;  %s1529_s7 = inlined_call_operand.vmem [shape: f32[1,32], index: 7, kind: input, shape index: {}]   ;;  %s1530_s8 = inlined_call_operand.vmem [shape: bf16[32,64], index: 8, kind: input, shape index: {}]   ;;  %s1531_s9 = inlined_call_operand.vmem [shape: f32[1,64], index: 9, kind: input, shape index: {}]   ;;  %s1532_s10 = inlined_call_operand.vmem [shape: bf16[64,32], index: 10, kind: input, shape index: {}]   ;;  %s1533_s11 = inlined_call_operand.vmem [shape: f32[1,32], index: 11, kind: input, shape index: {}]   ;;  %s1534_s12 = inlined_call_operand.vmem [shape: f32[1,32], index: 12, kind: input, shape index: {}]   ;;  %s1535_s13 = inlined_call_operand.vmem [shape: f32[1,32], index: 13, kind: input, shape index: {}]   ;;  %s1536_s14 = inlined_call_operand.vmem [shape: f32[2,8,32], index: 14, kind: output, shape index: {}]  }
   0x1 LB: > { %s1137_s30 = sadd.s32 4294967295, %s1301_s29   ;;  %p1141_p0 = scmp.ge.s32.totalorder %s1301_s29, 1  ;;  %s1301_s29 = sphi %s1386_s29, %s24_s29  }
   0x2   : > { %p419_p1 = scmp.lt.s32.totalorder %s1301_s29, 3 }
   0x4   : > { %p420_p2 = pnand %p1141_p0, %p419_p1 }
   0x5   : > { %v1271_v0 = vld [vmem:[%s1524_s2] sm:$0xff] (!%p420_p2)   ;;  %v1303_v1 = vmov (!%p420_p2), 0.0   ;;  %v1272_v2 = vld [vmem:[%s1524_s2 + $0x8] sm:$0xff] (!%p420_p2)   ;;  %vm1304_vm0 = vmmov (!%p420_p2), 0   ;;  %p466_p3 = scmp.lt.s32.totalorder (!%p420_p2), %s1137_s30, 1  ;;  %vm504_vm1 = vcmask (!%p420_p2), 261120  }
   0x6   : > { %423 = sbr.rel (%p420_p2) target bundleno = 2530 (0x9e2), region = 76  ;;  %1195 = vmatprep.subr.bf16.mxu0 (!%p420_p2), %v1303_v1  ;;  %1203 = vmatprep.subr.bf16.mxu1 (!%p420_p2), %v1303_v1  ;;  %v1144_v5 = vld [vmem:[%s1525_s3] ss:$0 sm:$0xff] (!%p420_p2)  ;;  %s1305_s25 = smov (!%p420_p2), 112   ;;  %vm552_vm2 = vcmask (!%p420_p2), 130048   ;;  %vm607_vm3 = vcmask (!%p420_p2), 64512  }
   0x7   : > { %1196 = vmatpush3.bf16.msra.mxu0 (!%p420_p2), %v1271_v0  ;;  %1199 = vmatprep.mubr.msk.bf16.mxu0 (!%p420_p2), %vm1304_vm0, %v1303_v1  ;;  %s1306_s26 = smov (!%p420_p2), 96   ;;  %s1307_s27 = smov (!%p420_p2), 80   ;;  %vm625_vm4 = vcmask (!%p420_p2), 1043456   ;;  %v1273_v54 = vld [vmem:[%s1526_s4] sm:$0xff] (!%p420_p2)   ;;  %v1274_v55 = vld [vmem:[%s1526_s4 + $0x8] sm:$0xff] (!%p420_p2)   ;;  %vm1000_vm5 = vcmask (!%p420_p2), 523264  }
   0x8   : > { %1197 = vmatprep.subr.bf16.mxu0 (!%p420_p2), %v1303_v1  ;;  %1205 = vmatprep.mubr.msk.bf16.mxu1 (!%p420_p2), %vm1304_vm0, %v1303_v1  ;;  %s1308_s17 = smov (!%p420_p2), 64   ;;  %s1309_s18 = smov (!%p420_p2), 48  }
   0x9   : > { %s1310_s24 = smov (!%p420_p2), 16  }
   0xb   : > { %1198 = vmatpush3.bf16.msra.mxu0 (!%p420_p2), %v1272_v2 }
   0xc   : > { %1209 = vmatprep.subr.bf16.mxu0 (!%p420_p2), %v1303_v1 }
   0xd   : > { %s1538_s30 = smov (!%p466_p3, %s1137_s30), 1 }
   0xe   : > { %s1142_s19 = sshll.u32 %s1538_s30, 3  ;;  %s472_s16 = scalar_lea.vmem %s1523_s1, %s1538_s30 }
   0xf   : > { %s469_s22 = scalar_lea.vmem %s1522_s0, %s1142_s19  ;;  %v1149_v18 = vld [vmem:[%s472_s16] ss:$0 sm:$0xff] }
  0x10   : > { %v1416_v3 = vld [vmem:[%s469_s22] sm:$0xff] }
  0x11   : > { %v480_v4 = vpack.c.bf16 %v1416_v3, %v1416_v3 }
  0x13   : > { %1200 = vmatmul.mubr.msk.bf16.vlgmr.msra.gmra.mrb[0].mxu0 %vm504_vm1, %v480_v4 }
  0x14   : > { %1211 = vmatprep.mubr.msk.bf16.mxu0 %vm1304_vm0, %v1303_v1 }
  0xe6   : > { %v542_v6 = vpop.f32.mrb[0].mxu0 }
  0xe7   : > { %v543_v7 = vadd.f32 %v1144_v5, %v542_v6  ;;  %v1201_v8 = vpop.f32.mrb[1].mxu0  ;;  %v1153_v5 = vld [vmem:[%s1527_s5] ss:$0 sm:$0xff] }
  0xe8   : > { %v545_v9 = vpop.f32.mrb[2].mxu0 }
  0xe9   : > { %v548_v10 = vpack.c.bf16 %v543_v7, %v543_v7  ;;  %v1202_v11 = vpop.f32.mrb[3].mxu0 }
  0xeb   : > { %669 = vrot.lane.b32.xlu1 %v548_v10, %s1305_s25  ;;  %550 = vrot.lane.b32.xlu0 %v548_v10, %s1306_s26 }
  0xef   : > { %671 = vrot.lane.b32.xlu0 %v548_v10, %s1307_s27  ;;  %s476_s27 = scalar_lea.vmem %s1536_s14, %s1142_s19 }
 0x15d   : > { %v551_v12 = vpop.permute.xlu0 %550  ;;  %v670_v16 = vpop.permute.xlu1 %669 }
 0x15e   : > { %v557_v13 = vsel %vm552_vm2, %v551_v12, 0 }
 0x15f   : > { %1204 = vmatpush3.bf16.xpose.msra.mxu1 %v557_v13 }
 0x160   : > { %1215 = vmatprep.subr.bf16.mxu1 %v1303_v1 }
 0x161   : > { %v672_v14 = vpop.permute.xlu0 %671 }
 0x162   : > { %v677_v15 = vsel %vm552_vm2, %v672_v14, 0 }
 0x166   : > { %1206 = vmatmul.mubr.msk.bf16.vlgmr.msra.gmra.mrb[0].mxu1 %vm552_vm2, %v548_v10 }
 0x167   : > { %1216 = vmatpush3.bf16.xpose.msra.mxu1 %v677_v15  ;;  %1217 = vmatprep.mubr.msk.bf16.mxu1 %vm1304_vm0, %v1303_v1 }
 0x168   : > { %1227 = vmatprep.subr.bf16.mxu1 %v1303_v1 }
 0x16e   : > { %1218 = vmatmul.mubr.msk.bf16.vlgmr.msra.gmra.mrb[4].mxu1 %vm552_vm2, %v670_v16 }
 0x16f   : > { %1231 = vmatprep.mubr.msk.bf16.mxu1 %vm1304_vm0, %v1303_v1  ;;  %1228 = vmatpush3.bf16.msra.mxu1 %v1273_v54 }
 0x170   : > { %1229 = vmatprep.subr.bf16.mxu1 %v1303_v1 }
 0x173   : > { %1230 = vmatpush3.bf16.msra.mxu1 %v1274_v55 }
 0x174   : > { %1243 = vmatprep.subr.bf16.mxu1 %v1303_v1 }
 0x239   : > { %v593_v17 = vpop.f32.mrb[0].mxu1 }
 0x23a   : > { %v599_v19 = vmul.f32 0.25, %v593_v17  ;;  %v1207_v20 = vpop.f32.mrb[1].mxu1 }
 0x23b   : > { %v596_v21 = vpop.f32.mrb[2].mxu1 }
 0x23c   : > { %v1208_v22 = vpop.f32.mrb[3].mxu1  ;;  %v606_v23 = vadd.f32 %v1149_v18, %v599_v19  ;;  %v1276_v19 = vld [vmem:[%s1530_s8 + $0x8] sm:$0xff]  }
 0x23e   : > { %v608_v24 = vsel %vm607_vm3, %v606_v23, -inf }
 0x23f   : > { %609 = vmax.xlane.f32.xlu1 %v608_v24 }
 0x241   : > { %v713_v25 = vpop.f32.mrb[4].mxu1 }
 0x242   : > { %v719_v26 = vmul.f32 0.25, %v713_v25  ;;  %v1219_v27 = vpop.f32.mrb[5].mxu1  ;;  %v1158_v25 = vld [vmem:[%s1529_s7] ss:$0 sm:$0xff] }
 0x243   : > { %v716_v28 = vpop.f32.mrb[6].mxu1 }
 0x244   : > { %v1220_v29 = vpop.f32.mrb[7].mxu1  ;;  %v720_v30 = vadd.f32 %v1149_v18, %v719_v26  ;;  %v1275_v18 = vld [vmem:[%s1530_s8] sm:$0xff]  }
 0x245   : > { %v1277_v29 = vld [vmem:[%s1532_s10] sm:$0xff]  }
 0x246   : > { %v721_v31 = vsel %vm607_vm3, %v720_v30, -inf }
 0x247   : > { %722 = vmax.xlane.f32.xlu0 %v721_v31  ;;  %v1279_v31 = vld [vmem:[%s1532_s10 + $0x10] sm:$0xff]  }
 0x2cc   : > { %v610_v32 = vpop.xlane.xlu1 %609 }
 0x2cd   : > { %v611_v33 = vsub.f32 %v606_v23, %v610_v32  ;;  %v1157_v23 = vld [vmem:[%s1528_s6] ss:$0 sm:$0xff]  ;;  %v1280_v32 = vld [vmem:[%s1532_s10 + $0x18] sm:$0xff]  }
 0x2cf   : > { %v612_v34 = vmul.f32 1.442695, %v611_v33  ;;  %v1159_v33 = vld [vmem:[%s1531_s9] ss:$0 sm:$0xff] }
 0x2d1   : > { %1281 = vpow2.f32 %v612_v34 }
 0x2d4   : > { %v723_v35 = vpop.xlane.xlu0 %722 }
 0x2d5   : > { %v724_v36 = vsub.f32 %v720_v30, %v723_v35  ;;  %v1278_v30 = vld [vmem:[%s1532_s10 + $0x8] sm:$0xff]  }
 0x2d7   : > { %v725_v37 = vmul.f32 1.442695, %v724_v36 }
 0x2d9   : > { %1283 = vpow2.f32 %v725_v37 }
 0x2db   : > { %v1282_v38 = vpop.eup %1281 }
 0x2dc   : > { %v614_v39 = vsel %vm607_vm3, %v1282_v38, 0.0 }
 0x2dd   : > { %615 = vadd.xlane.f32.xlu0 %v614_v39 }
 0x2e3   : > { %v1284_v40 = vpop.eup %1283 }
 0x2e4   : > { %v727_v41 = vsel %vm607_vm3, %v1284_v40, 0.0 }
 0x2e5   : > { %728 = vadd.xlane.f32.xlu1 %v727_v41 }
 0x2f3   : > { %620 = vrot.lane.b32.xlu0 %v548_v10, %s1308_s17 }
 0x2f6   : > { %733 = vrot.lane.b32.xlu1 %v548_v10, %s1309_s18 }
 0x36a   : > { %v616_v42 = vpop.xlane.xlu0 %615 }
 0x36b   : > { %1285 = vrcp.f32 %v616_v42 }
 0x36e   : > { %v621_v43 = vpop.permute.xlu0 %620 }
 0x36f   : > { %v627_v44 = vsel %vm625_vm4, %v621_v43, 0 }
 0x370   : > { %1210 = vmatpush3.bf16.msra.mxu0 %v627_v44 }
 0x371   : > { %1221 = vmatprep.subr.bf16.mxu0 %v1303_v1 }
 0x372   : > { %v729_v45 = vpop.xlane.xlu1 %728 }
 0x373   : > { %1287 = vrcp.f32 %v729_v45 }
 0x375   : > { %v1286_v46 = vpop.eup %1285 }
 0x376   : > { %v618_v47 = vmul.f32 %v1286_v46, %v1282_v38  ;;  %v734_v48 = vpop.permute.xlu1 %733 }
 0x377   : > { %v739_v50 = vsel %vm625_vm4, %v734_v48, 0  ;;  %v1163_v48 = vld [vmem:[%s1533_s11] ss:$0 sm:$0xff] }
 0x378   : > { %v619_v49 = vpack.c.bf16 %v618_v47, %v618_v47 }
 0x37a   : > { %1212 = vmatmul.mubr.msk.bf16.vlgmr.msra.gmra.mrb[4].mxu0 %vm607_vm3, %v619_v49 }
 0x37b   : > { %1222 = vmatpush3.bf16.msra.mxu0 %v739_v50  ;;  %1223 = vmatprep.mubr.msk.bf16.mxu0 %vm1304_vm0, %v1303_v1 }
 0x37c   : > { %1235 = vmatprep.subr.bf16.mxu0 %v1303_v1 }
 0x37d   : > { %v1288_v51 = vpop.eup %1287 }
 0x37e   : > { %v731_v52 = vmul.f32 %v1288_v51, %v1284_v40 }
 0x380   : > { %v732_v53 = vpack.c.bf16 %v731_v52, %v731_v52 }
 0x382   : > { %1224 = vmatmul.mubr.msk.bf16.vlgmr.msra.gmra.mrb[8].mxu0 %vm607_vm3, %v732_v53 }
 0x383   : > { %1239 = vmatprep.mubr.msk.bf16.mxu0 %vm1304_vm0, %v1303_v1  ;;  %1236 = vmatpush3.bf16.msra.mxu0 %v1275_v18 }
 0x384   : > { %1237 = vmatprep.subr.bf16.mxu0 %v1303_v1 }
 0x387   : > { %1238 = vmatpush3.bf16.msra.mxu0 %v1276_v19 }
 0x44d   : > { %v663_v56 = vpop.f32.mrb[4].mxu0 }
 0x44e   : > { %v1213_v57 = vpop.f32.mrb[5].mxu0 }
 0x44f   : > { %v666_v58 = vpop.f32.mrb[6].mxu0 }
 0x450   : > { %v1214_v59 = vpop.f32.mrb[7].mxu0 }
 0x455   : > { %v775_v60 = vpop.f32.mrb[8].mxu0 }
 0x456   : > { %782 = vrot.lane.b32.xlu1 %v775_v60, %s1310_s24  ;;  %v1225_v61 = vpop.f32.mrb[9].mxu0 }
 0x457   : > { %v778_v62 = vpop.f32.mrb[10].mxu0 }
 0x458   : > { %v1226_v63 = vpop.f32.mrb[11].mxu0 }
 0x4c8   : > { %v783_v0 = vpop.permute.xlu1 %782 }
 0x4c9   : > { %v785_v2 = vsel %vm552_vm2, %v663_v56, %v783_v0 }
 0x4ca   : > { %v786_v4 = vpack.c.bf16 %v785_v2, %v785_v2  ;;  %v1169_v2 = vld [vmem:[%s1534_s12] ss:$0 sm:$0xff] }
 0x4cc   : > { %1232 = vmatmul.mubr.msk.bf16.vlgmr.msra.gmra.mrb[8].mxu1 %vm504_vm1, %v786_v4 }
 0x4cd   : > { %1251 = vmatprep.mubr.msk.bf16.mxu1 %vm1304_vm0, %v1303_v1  ;;  %1244 = vmatpush3.bf16.msra.mxu1 %v1277_v29 }
 0x4ce   : > { %1245 = vmatprep.subr.bf16.mxu1 %v1303_v1 }
 0x4d1   : > { %1246 = vmatpush3.bf16.msra.mxu1 %v1278_v30 }
 0x4d2   : > { %1247 = vmatprep.subr.bf16.mxu1 %v1303_v1 }
 0x4d5   : > { %1248 = vmatpush3.bf16.msra.mxu1 %v1279_v31 }
 0x4d6   : > { %1249 = vmatprep.subr.bf16.mxu1 %v1303_v1 }
 0x4d9   : > { %1250 = vmatpush3.bf16.msra.mxu1 %v1280_v32 }
 0x59f   : > { %v847_v6 = vpop.f32.mrb[8].mxu1 }
 0x5a0   : > { %v848_v7 = vadd.f32 %v1153_v5, %v847_v6  ;;  %v1233_v8 = vpop.f32.mrb[9].mxu1  ;;  %v1170_v5 = vld [vmem:[%s1535_s13] ss:$0 sm:$0xff] }
 0x5a1   : > { %v850_v9 = vpop.f32.mrb[10].mxu1 }
 0x5a2   : > { %v1234_v10 = vpop.f32.mrb[11].mxu1  ;;  %v853_v11 = vadd.f32 %v848_v7, %v1416_v3 }
 0x5a4   : > { %v856_v12 = vsel %vm504_vm1, %v853_v11, 0.0 }
 0x5a5   : > { %857 = vadd.xlane.f32.xlu0 %v856_v12 }
 0x632   : > { %v858_v13 = vpop.xlane.xlu0 %857 }
 0x633   : > { %v860_v14 = vmul.f32 0.03125, %v858_v13 }
 0x635   : > { %v861_v15 = vsub.f32 %v853_v11, %v860_v14 }
 0x637   : > { %v862_v16 = vmul.f32 %v861_v15, %v861_v15 }
 0x639   : > { %v863_v17 = vsel %vm504_vm1, %v862_v16, 0.0 }
 0x63a   : > { %864 = vadd.xlane.f32.xlu1 %v863_v17 }
 0x6c7   : > { %v865_v3 = vpop.xlane.xlu1 %864 }
 0x6c8   : > { %v866_v20 = vmul.f32 0.03125, %v865_v3 }
 0x6ca   : > { %v867_v21 = vadd.f32 1e-12, %v866_v20 }
 0x6cc   : > { %1289 = vrsqrt.f32 %v867_v21 }
 0x6d6   : > { %v1290_v22 = vpop.eup %1289 }
 0x6d7   : > { %v869_v24 = vmul.f32 %v1290_v22, %v861_v15 }
 0x6d9   : > { %v876_v26 = vmul.f32 %v1157_v23, %v869_v24 }
 0x6db   : > { %v883_v27 = vadd.f32 %v1158_v25, %v876_v26 }
 0x6dd   : > { %v884_v28 = vpack.c.bf16 %v883_v27, %v883_v27 }
 0x6df   : > { %1240 = vmatmul.mubr.msk.bf16.vlgmr.msra.gmra.mrb[12].mxu0 %vm504_vm1, %v884_v28 }
 0x7b2   : > { %v945_v34 = vpop.f32.mrb[12].mxu0 }
 0x7b3   : > { %v946_v35 = vadd.f32 %v1159_v33, %v945_v34  ;;  %v1241_v36 = vpop.f32.mrb[13].mxu0 }
 0x7b4   : > { %v948_v37 = vpop.f32.mrb[14].mxu0 }
 0x7b5   : > { %v952_v38 = vmul.f32 0.044715, %v946_v35  ;;  %v1242_v39 = vpop.f32.mrb[15].mxu0  ;;  %v951_v45 = vmul.f32 0.5, %v946_v35 }
 0x7b7   : > { %v953_v40 = vmul.f32 %v952_v38, %v946_v35 }
 0x7b9   : > { %v954_v41 = vmul.f32 %v953_v40, %v946_v35 }
 0x7bb   : > { %v955_v42 = vadd.f32 %v954_v41, %v946_v35 }
 0x7bd   : > { %v956_v43 = vmul.f32 0.7978846, %v955_v42 }
 0x7bf   : > { %1291 = vtanh.f32 %v956_v43 }
 0x7c9   : > { %v1292_v44 = vpop.eup %1291 }
 0x7ca   : > { %v958_v46 = vadd.f32 1.0, %v1292_v44 }
 0x7cc   : > { %v959_v1 = vmul.f32 %v958_v46, %v951_v45 }
 0x7ce   : > { %v960_v47 = vpack.c.bf16 %v959_v1, %v959_v1 }
 0x7d0   : > { %1252 = vmatmul.mubr.msk.bf16.vlgmr.msra.gmra.mrb[12].mxu1 %vm1000_vm5, %v960_v47 }
 0x8a3   : > { %v1038_v49 = vpop.f32.mrb[12].mxu1 }
 0x8a4   : > { %v1039_v50 = vadd.f32 %v1163_v48, %v1038_v49  ;;  %v1253_v51 = vpop.f32.mrb[13].mxu1 }
 0x8a5   : > { %v1041_v52 = vpop.f32.mrb[14].mxu1 }
 0x8a6   : > { %v1254_v53 = vpop.f32.mrb[15].mxu1  ;;  %v1044_v54 = vadd.f32 %v1039_v50, %v883_v27 }
 0x8a8   : > { %v1047_v55 = vsel %vm504_vm1, %v1044_v54, 0.0 }
 0x8a9   : > { %1048 = vadd.xlane.f32.xlu0 %v1047_v55 }
 0x936   : > { %v1049_v56 = vpop.xlane.xlu0 %1048 }
 0x937   : > { %v1050_v57 = vmul.f32 0.03125, %v1049_v56 }
 0x939   : > { %v1051_v58 = vsub.f32 %v1044_v54, %v1050_v57 }
 0x93b   : > { %v1052_v59 = vmul.f32 %v1051_v58, %v1051_v58 }
 0x93d   : > { %v1053_v60 = vsel %vm504_vm1, %v1052_v59, 0.0 }
 0x93e   : > { %1054 = vadd.xlane.f32.xlu0 %v1053_v60 }
 0x9cb   : > { %v1055_v61 = vpop.xlane.xlu0 %1054 }
 0x9cc   : > { %v1056_v62 = vmul.f32 0.03125, %v1055_v61 }
 0x9ce   : > { %v1057_v63 = vadd.f32 1e-12, %v1056_v62 }
 0x9d0   : > { %1293 = vrsqrt.f32 %v1057_v63 }
 0x9da   : > { %v1294_v0 = vpop.eup %1293 }
 0x9db   : > { %v1059_v4 = vmul.f32 %v1294_v0, %v1051_v58 }
 0x9dd   : > { %v1066_v6 = vmul.f32 %v1169_v2, %v1059_v4 }
 0x9df   : > { %v1073_v7 = vadd.f32 %v1170_v5, %v1066_v6 }
 0x9e1   : > { %1074 = vst.msk [vmem:[%s476_s27] sm:$0xff] %vm504_vm1, %v1073_v7 }
 0x9e2 PF: > { %s24_s29 = sadd.s32 1, %s1301_s29  }
 0x9e3   : > { %p21_p4 = scmp.ge.s32.totalorder %s24_s29, 4  }
 0x9e5   :  { %23 = sbr.rel (!%p21_p4) target bundleno = 1 (0x1), region = 109 }

</bundles_post_ra>
